<compile_context>
chip_gen: v5e
topology: v5e:2x2
jax: 0.10.0
libtpu: 0.0.40
codegen_flags: <defaults>
</compile_context>

<pallas_src>
import jax
import jax.numpy as jnp
from jax.experimental import pallas as pl
from jax.experimental.pallas import tpu as pltpu


def _nlinear_kernel(x_ref, w_ref, b_ref, o_ref):
    # x_ref: (S, Ct), w_ref: (P, S), b_ref: (P, 1), o_ref: (P, Ct)
    x = x_ref[...]
    S = x.shape[0]
    seq_last = x[S - 1:S, :]                       # (1, Ct)  last time step per channel
    xc = x - seq_last                              # normalization (subtract last)
    # Plain matmul W @ xc contracting S -> (P, Ct); no transpose needed in this
    # layout, feeds the MXU directly.
    y = jnp.dot(w_ref[...], xc, preferred_element_type=jnp.float32)
    y = y + b_ref[...] + seq_last                  # bias (P,1) + re-add last value (1,Ct)
    o_ref[...] = y.astype(o_ref.dtype)


def nlinear_forward(x, weight, bias, *, tile_c=512):
    """x: [B, seq_len, C] -> [B, pred_len, C]. weight: [pred_len, seq_len], bias: [pred_len]."""
    B, S, C = x.shape
    P = weight.shape[0]

    # Channel tile on the lane axis: either the full C extent (small C) or a
    # multiple of 128 (lane-dense loads/stores for large C). Pallas masks the
    # boundary tile, and since each output lane depends only on its own input
    # lane, padded lanes never leak into valid results.
    if C <= tile_c:
        tc = C
    else:
        tc = max(128, (tile_c // 128) * 128)
    n_ct = pl.cdiv(C, tc)

    b2 = bias.reshape(P, 1)

    # Explicit VMEM budget with headroom (v7x has only 64 MiB physical /
    # 32 MiB scoped default): double-buffered x and out blocks + resident W, b.
    block_bytes = 4 * (2 * S * tc + 2 * P * tc + P * S + P)
    vmem_limit = int(min(100 * 1024 * 1024, max(16 * 1024 * 1024, 4 * block_bytes)))

    cost = pl.CostEstimate(
        flops=2 * B * S * P * C + 3 * B * P * C + B * S * C,
        transcendentals=0,
        bytes_accessed=4 * (B * S * C + B * P * C + P * S + P),
    )

    out = pl.pallas_call(
        _nlinear_kernel,
        out_shape=jax.ShapeDtypeStruct((B, P, C), x.dtype),
        grid=(B, n_ct),
        in_specs=[
            # x block: one batch element, full seq, one channel tile
            pl.BlockSpec((pl.Squeezed(), S, tc), lambda b, c: (b, 0, c)),
            # weight + bias: constant index_map -> stay resident in VMEM
            pl.BlockSpec((P, S), lambda b, c: (0, 0)),
            pl.BlockSpec((P, 1), lambda b, c: (0, 0)),
        ],
        out_specs=pl.BlockSpec((pl.Squeezed(), P, tc), lambda b, c: (b, 0, c)),
        compiler_params=pltpu.CompilerParams(
            dimension_semantics=("parallel", "parallel"),
            vmem_limit_bytes=vmem_limit,
        ),
        cost_estimate=cost,
    )(x, weight, b2)

    return out


def nlinear_reference(x, weight, bias):
    """Pure-JAX reference matching the PyTorch forward (individual=False)."""
    seq_last = x[:, -1:, :]
    xc = x - seq_last
    y = jnp.einsum('bsc,ps->bpc', xc, weight) + bias[None, :, None]
    return y + seq_last


if __name__ == "__main__":
    # Module config (small, consistent with NLinear(seq_len, pred_len, enc_in, individual=False))
    seq_len, pred_len, enc_in = 8, 12, 4
    batch = 2

    key = jax.random.PRNGKey(0)
    k_x, k_w, k_b = jax.random.split(key, 3)

    # Deterministic parameter init mimicking nn.Linear (uniform(-1/sqrt(in), 1/sqrt(in)))
    bound = 1.0 / (seq_len ** 0.5)
    weight = jax.random.uniform(k_w, (pred_len, seq_len), jnp.float32, -bound, bound)
    bias = jax.random.uniform(k_b, (pred_len,), jnp.float32, -bound, bound)

    # Input [B, seq_len, enc_in]
    x = jax.random.normal(k_x, (batch, seq_len, enc_in), jnp.float32)

    out = nlinear_forward(x, weight, bias)
    out = jax.block_until_ready(out)

    ref = nlinear_reference(x, weight, bias)
    assert out.shape == (batch, pred_len, enc_in), out.shape
    assert jnp.allclose(out, ref, atol=1e-5, rtol=1e-5), "mismatch vs reference"

    print("KERNEL_OK")
</pallas_src>

<mosaic_0001>
module attributes {stable_mosaic.version = 11 : i64} {
  func.func @_nlinear_kernel(%arg0: i32, %arg1: i32, %arg2: memref<1x8x4xf32, #tpu.memory_space<vmem>>, %arg3: memref<12x8xf32, #tpu.memory_space<vmem>>, %arg4: memref<12x1xf32, #tpu.memory_space<vmem>>, %arg5: memref<1x12x4xf32, #tpu.memory_space<vmem>>) attributes {dimension_semantics = [#tpu.dimension_semantics<parallel>, #tpu.dimension_semantics<parallel>], iteration_bounds = array<i64: 2, 1>, scalar_prefetch = 0 : i64, scratch_operands = 0 : i64, tpu.core_type = #tpu.core_type<tc>, window_params = [{transform_indices = @transform_0, window_bounds = array<i64: 1, 8, 4>}, {pipeline_mode = #tpu.pipeline_mode<synchronous>, transform_indices = @transform_1, window_bounds = array<i64: 12, 8>}, {pipeline_mode = #tpu.pipeline_mode<synchronous>, transform_indices = @transform_2, window_bounds = array<i64: 12, 1>}, {transform_indices = @transform_3, window_bounds = array<i64: 1, 12, 4>}]} {
    %c0 = arith.constant 0 : index
    %c0_0 = arith.constant 0 : index
    %c0_1 = arith.constant 0 : index
    %0 = vector.load %arg2[%c0, %c0_0, %c0_1] : memref<1x8x4xf32, #tpu.memory_space<vmem>>, vector<1x8x4xf32>
    %1 = vector.shape_cast %0 : vector<1x8x4xf32> to vector<8x4xf32>
    %2 = vector.extract_strided_slice %1 {offsets = [7, 0], sizes = [1, 4], strides = [1, 1]} : vector<8x4xf32> to vector<1x4xf32>
    %3 = vector.broadcast %2 : vector<1x4xf32> to vector<8x4xf32>
    %4 = arith.subf %1, %3 : vector<8x4xf32>
    %c0_2 = arith.constant 0 : index
    %c0_3 = arith.constant 0 : index
    %5 = vector.load %arg3[%c0_2, %c0_3] : memref<12x8xf32, #tpu.memory_space<vmem>>, vector<12x8xf32>
    %cst = arith.constant dense<0.000000e+00> : vector<12x4xf32>
    %6 = tpu.matmul %5, %4, %cst {dimension_numbers = #tpu.dot_dimension_numbers<[1], [0], [0], [1], [0, 0, 1, 1], [], []>} : vector<12x8xf32>, vector<8x4xf32>, vector<12x4xf32> -> vector<12x4xf32>
    %c0_4 = arith.constant 0 : index
    %c0_5 = arith.constant 0 : index
    %7 = vector.load %arg4[%c0_4, %c0_5] : memref<12x1xf32, #tpu.memory_space<vmem>>, vector<12x1xf32>
    %8 = vector.broadcast %7 : vector<12x1xf32> to vector<12x4xf32>
    %9 = arith.addf %6, %8 : vector<12x4xf32>
    %10 = vector.broadcast %2 : vector<1x4xf32> to vector<12x4xf32>
    %11 = arith.addf %9, %10 : vector<12x4xf32>
    %c0_6 = arith.constant 0 : index
    %c0_7 = arith.constant 0 : index
    %c0_8 = arith.constant 0 : index
    %12 = vector.load %arg5[%c0_6, %c0_7, %c0_8] : memref<1x12x4xf32, #tpu.memory_space<vmem>>, vector<1x12x4xf32>
    %13 = vector.shape_cast %12 : vector<1x12x4xf32> to vector<12x4xf32>
    %14 = vector.shape_cast %11 : vector<12x4xf32> to vector<1x12x4xf32>
    tpu.vector_store %arg5[%c0_6, %c0_7, %c0_8], %14 {strides = array<i32>} : memref<1x12x4xf32, #tpu.memory_space<vmem>>, vector<1x12x4xf32>,
    return
  }
  func.func @transform_0(%arg0: i32, %arg1: i32) -> (i32, i32, i32) {
    %c0_i32 = arith.constant 0 : i32
    %c0_i32_0 = arith.constant 0 : i32
    return %arg0, %c0_i32, %arg1 : i32, i32, i32
  }
  func.func @transform_1(%arg0: i32, %arg1: i32) -> (i32, i32) {
    %c0_i32 = arith.constant 0 : i32
    %c0_i32_0 = arith.constant 0 : i32
    %c0_i32_1 = arith.constant 0 : i32
    return %c0_i32, %c0_i32_0 : i32, i32
  }
  func.func @transform_2(%arg0: i32, %arg1: i32) -> (i32, i32) {
    %c0_i32 = arith.constant 0 : i32
    %c0_i32_0 = arith.constant 0 : i32
    %c0_i32_1 = arith.constant 0 : i32
    return %c0_i32, %c0_i32_0 : i32, i32
  }
  func.func @transform_3(%arg0: i32, %arg1: i32) -> (i32, i32, i32) {
    %c0_i32 = arith.constant 0 : i32
    %c0_i32_0 = arith.constant 0 : i32
    return %arg0, %c0_i32, %arg1 : i32, i32, i32
  }
}

</mosaic_0001>

<bundles_post_ra>
// kernel: tpu_custom_call.1
= control target key start
LH: loop header
LB: loop body
LE: loop exit
PB: predicated region body
PF: predicated region fallthrough
CT: control target
= control target key end

     0   :  { %s417_s12 = smov 0   ;;  %s419_s13 = smov 0   ;;  %s462_s0 = inlined_call_operand.vmem [shape: f32[2,8,4], index: 0, kind: input, shape index: {}]   ;;  %s463_s1 = inlined_call_operand.vmem [shape: f32[12,8], index: 1, kind: input, shape index: {}]   ;;  %s464_s2 = inlined_call_operand.vmem [shape: f32[12,1], index: 2, kind: input, shape index: {}]   ;;  %s465_s3 = inlined_call_operand.vmem [shape: f32[2,12,4], index: 3, kind: output, shape index: {}]  }
   0x1   :  { %s421_s14 = smov 0  }
   0x2 LB: > { %s25_s15 = sadd.s32 1, %s390_s13  ;;  %p336_p0 = scmp.ge.s32.totalorder %s394_s14, 1  ;;  %s394_s14 = sphi %s421_s14, %s13_s14   ;;  %s390_s13 = sphi %s419_s13, %s467_s13   ;;  %s386_s12 = sphi %s417_s12, %s466_s12  }
   0x3   : > { %p27_p1 = scmp.ge.s32.totalorder %s25_s15, 2  ;;  %p155_p2 = scmp.lt.s32.totalorder %s394_s14, 3 }
   0x5   : > { %s469_s15 = smov (%p27_p1, %s25_s15), 0  ;;  %p156_p3 = pnand %p336_p0, %p155_p2 }
   0x6   : > { %p184_p4 = scmp.lt.s32.totalorder (!%p156_p3), %s386_s12, 1 }
   0x7   : > { %159 = sbr.rel (%p156_p3) target bundleno = 153 (0x99), region = 32 }
   0xc   : > { %v204_v0 = vld [vmem:[%s464_s2] sm:$0xff]  ;;  %v396_v1 = vmov 0   ;;  %s471_s12 = smov (!%p184_p4, %s386_s12), 1  ;;  %v205_v4 = vld [vmem:[%s464_s2 + $0x8] sm:$0xf]  ;;  %vm216_vm0 = vcmask 64512  }
   0xd   : > { %371 = vset.pattern.permute.xlu0 %v396_v1  ;;  %s337_s18 = sshll.u32 %s471_s12, 3  ;;  %v202_v6 = vld [vmem:[%s463_s1] sm:$0xff]  ;;  %v203_v7 = vld [vmem:[%s463_s1 + $0x8] sm:$0xf]  ;;  %s344_s28 = sshll.u32 %s471_s12, 4  ;;  %vm248_vm1 = vcmask 31744  }
   0xe   : > { %208 = vperm.xlu0 %371, %v204_v0   ;;  %s190_s21 = scalar_lea.vmem %s462_s0, %s337_s18  ;;  %s198_s4 = scalar_lea.vmem %s465_s3, %s344_s28  ;;  %vm250_vm2 = vcmask 27648  }
   0xf   : > { %v199_v2 = vld [vmem:[%s190_s21] sm:$0xff] }
  0x10   : > { %v200_v3 = vperm.slane %v199_v2, 7 }
  0x12   : > { %v201_v5 = vsub.f32 %v199_v2, %v200_v3 }
  0x14   : > { %238 = vmatpush.msra.mxu0 %v201_v5  ;;  %345 = vmatpush.msra.mxu1 %v201_v5 }
  0x15   : > { %340 = vmatmul.msk.f32.vlgmr.msra.gmra.mxu0 %vm216_vm0, %v202_v6  ;;  %341 = vmatmul.msk.f32.vlgmr.msra.gmra.mxu1 %vm216_vm0, %v203_v7 }
  0x16   : > { %213 = vperm.xlu0 %371, %v205_v4  }
  0x80   : > { %v209_v8 = vpop.permute.xlu0 %208 }
  0x88   : > { %v214_v9 = vpop.permute.xlu0 %213 }
  0x92   : > { %v240_v10 = vpop.f32.mrf.mxu0  ;;  %v243_v11 = vpop.f32.mrf.mxu1 }
  0x93   : > { %v241_v12 = vadd.f32 %v240_v10, %v209_v8  ;;  %v244_v13 = vadd.f32 %v243_v11, %v214_v9 }
  0x95   : > { %v246_v14 = vadd.f32 %v241_v12, %v200_v3  ;;  %v247_v15 = vadd.f32 %v244_v13, %v200_v3 }
  0x97   : > { %249 = vst.msk [vmem:[%s198_s4] sm:$0xff] %vm248_vm1, %v246_v14 }
  0x98   : > { %251 = vst.msk [vmem:[%s198_s4 + $0x8] sm:$0xf] %vm250_vm2, %v247_v15 }
  0x99 PF: > { %s13_s14 = sadd.s32 1, %s394_s14   ;;  %s466_s12 = smov %s390_s13 }
  0x9a   : > { %p10_p5 = scmp.ge.s32.totalorder %s13_s14, 4   ;;  %s467_s13 = smov %s469_s15 }
  0x9c   :  { %12 = sbr.rel (!%p10_p5) target bundleno = 2 (0x2), region = 62 }

</bundles_post_ra>
